<compile_context>
chip_gen: v5e
topology: v5e:2x2
jax: 0.10.0
libtpu: 0.0.40
codegen_flags: <defaults>
</compile_context>

<pallas_src>
import math

import jax
import jax.numpy as jnp
from jax.experimental import pallas as pl
from jax.experimental.pallas import tpu as pltpu


def _make_lwf_kernel(temperature: float, eps: float, num_classes: int):
    inv_t = 1.0 / float(temperature)
    eps_over_c = float(eps) / float(num_classes)
    log1p_eps = math.log1p(float(eps))

    def kernel(old_ref, new_ref, ce_ref):
        tb = ce_ref.shape[1]  # rows in this tile (== block_b)

        # ---- new branch first: its (TB, C) temporaries die before the old branch ----
        s_new = new_ref[...].astype(jnp.float32) * inv_t
        e_new = jnp.exp(s_new - jnp.max(s_new, axis=1, keepdims=True))   # (TB, C)
        z_new = jnp.sum(e_new, axis=1, keepdims=True)                    # (TB, 1)

        # ---- old branch ----
        s_old = old_ref[...].astype(jnp.float32) * inv_t
        e_old = jnp.exp(s_old - jnp.max(s_old, axis=1, keepdims=True))   # (TB, C)
        z_old = jnp.sum(e_old, axis=1, keepdims=True)                    # (TB, 1)

        # log((softmax_old + eps/C) / (1 + eps))
        #   = log(e_old + (eps/C) * Z_old) - log(Z_old) - log1p(eps)
        # ce = -sum_c softmax_new * log_p_old
        #    = log(Z_old) + log1p(eps) - (sum_c e_new * log(e_old + (eps/C)*Z_old)) / Z_new
        w = jnp.sum(e_new * jnp.log(e_old + eps_over_c * z_old),
                    axis=1, keepdims=True)                               # (TB, 1)
        ce = (jnp.log(z_old) + log1p_eps) - w / z_new                    # (TB, 1)

        # Lane-dense store: (TB, 1) -> (1, TB) so the writeback is an unmasked,
        # lane-major vst instead of a sublane-strided masked store.
        ce_ref[...] = ce.reshape(1, tb)

    return kernel


def _pick_block_b(batch: int, num_classes: int, itemsize: int, vmem_cap: int) -> int:
    """Largest safe batch-tile, multiple of 128 (lane-dense output requirement)."""
    LANE = 128
    # VMEM bytes per batch row:
    #   inputs:       2 arrays x 2 pipeline buffers x C x itemsize
    #   temporaries:  ~4 live (block_b, C) f32 arrays in the kernel body
    bytes_per_row = 2 * 2 * num_classes * itemsize + 4 * num_classes * 4
    budget = min(vmem_cap // 2, 48 * 1024 * 1024)   # <= 48 MiB also fits v7x (64 MiB/TC)
    rows = budget // bytes_per_row
    rows = max(LANE, (rows // LANE) * LANE)
    rows = min(rows, 8192)                          # amortizes ~0.35us/step without huge tiles

    b_up = pl.cdiv(batch, LANE) * LANE
    if b_up >= 2 * LANE:
        # Keep at least 2 grid steps so the "parallel" axis can shard across
        # TensorCores (matters on v7x's dual-TC chips).
        half = pl.cdiv(pl.cdiv(b_up, 2), LANE) * LANE
        rows = min(rows, half)
    return min(rows, b_up)


def cross_entropy_loss(output_old, output_new, *, exp=1.0, size_average=True, eps=1e-5):
    """JAX/Pallas equivalent of the PyTorch CrossEntropyLoss module above."""
    B, C = output_old.shape
    assert output_new.shape == (B, C)

    itemsize = jnp.dtype(output_old.dtype).itemsize
    try:
        vmem_cap = int(pltpu.get_tpu_info().vmem_capacity_bytes)
    except Exception:
        vmem_cap = 64 * 1024 * 1024  # conservative default (v7x per-TC VMEM)

    block_b = _pick_block_b(B, C, itemsize, vmem_cap)
    grid = pl.cdiv(B, block_b)          # ragged last block handled by Pallas (no jnp.pad)
    vmem_limit = min(vmem_cap * 3 // 4, 64 * 1024 * 1024)

    # p**exp followed by renormalisation is exactly softmax(logits * exp),
    # i.e. a temperature-scaled softmax with T = 1/exp.
    kernel = _make_lwf_kernel(temperature=1.0 / float(exp), eps=eps, num_classes=C)

    ce_rows = pl.pallas_call(
        kernel,
        out_shape=jax.ShapeDtypeStruct((1, grid * block_b), jnp.float32),
        grid_spec=pltpu.PrefetchScalarGridSpec(
            num_scalar_prefetch=0,
            grid=(grid,),
            in_specs=[
                pl.BlockSpec((block_b, C), lambda i: (i, 0)),
                pl.BlockSpec((block_b, C), lambda i: (i, 0)),
            ],
            # Lane-dense per-row CE: each grid step writes its own 128*k-wide lane block.
            out_specs=pl.BlockSpec((1, block_b), lambda i: (0, i)),
        ),
        compiler_params=pltpu.CompilerParams(
            dimension_semantics=("parallel",),   # independent tiles -> shards across TCs
            vmem_limit_bytes=int(vmem_limit),
        ),
    )(output_old, output_new)

    # Drop junk tail rows from the partial last block BEFORE the mean
    # (they may contain NaN/Inf computed from uninitialized padding).
    ce = ce_rows[0, :B]
    if size_average:
        ce = jnp.mean(ce)
    return ce


def lwf_loss(output_old, output_new, *, w_kd=1.0, T=2.0, eps=1e-5):
    """JAX/Pallas equivalent of the PyTorch LwFLoss module."""
    return w_kd * cross_entropy_loss(
        output_old, output_new, exp=1.0 / T, size_average=True, eps=eps
    )


def _reference_lwf(output_old, output_new, w_kd=1.0, T=2.0, eps=1e-5):
    """Pure-JAX mirror of the original PyTorch forward."""
    p_exp = 1.0 / T
    p_old = jax.nn.softmax(output_old.astype(jnp.float32), axis=1)
    p_new = jax.nn.softmax(output_new.astype(jnp.float32), axis=1)
    if p_exp != 1.0:
        p_old = p_old ** p_exp
        p_old = p_old / jnp.sum(p_old, axis=1, keepdims=True)
        p_new = p_new ** p_exp
        p_new = p_new / jnp.sum(p_new, axis=1, keepdims=True)
    p_old = p_old + eps / p_old.shape[1]
    p_old = p_old / jnp.sum(p_old, axis=1, keepdims=True)
    ce = -jnp.sum(p_new * jnp.log(p_old), axis=1)
    return w_kd * jnp.mean(ce)


if __name__ == "__main__":
    key = jax.random.PRNGKey(0)
    k1, k2, k3, k4 = jax.random.split(key, 4)

    # Small demo shape consistent with the module: (batch, num_classes) logits.
    B, C = 16, 32
    output_old = jax.random.normal(k1, (B, C), dtype=jnp.float32)
    output_new = jax.random.normal(k2, (B, C), dtype=jnp.float32)

    loss = jax.block_until_ready(lwf_loss(output_old, output_new, w_kd=1.0, T=2.0))
    ref = _reference_lwf(output_old, output_new, w_kd=1.0, T=2.0)
    assert jnp.allclose(loss, ref, rtol=2e-5, atol=2e-5), (loss, ref)

    # Second check: batch not a multiple of the 128-row tile -> exercises the
    # ragged last block (junk tail rows must be sliced off, not averaged in).
    B2, C2 = 200, 64
    oo = jax.random.normal(k3, (B2, C2), dtype=jnp.float32)
    on = jax.random.normal(k4, (B2, C2), dtype=jnp.float32)
    loss2 = jax.block_until_ready(lwf_loss(oo, on, w_kd=0.5, T=2.0))
    ref2 = _reference_lwf(oo, on, w_kd=0.5, T=2.0)
    assert jnp.allclose(loss2, ref2, rtol=2e-5, atol=2e-5), (loss2, ref2)

    print("KERNEL_OK")
</pallas_src>

<mosaic_0001>
module attributes {stable_mosaic.version = 11 : i64} {
  func.func @kernel(%arg0: i32, %arg1: memref<128x32xf32, #tpu.memory_space<vmem>>, %arg2: memref<128x32xf32, #tpu.memory_space<vmem>>, %arg3: memref<1x128xf32, #tpu.memory_space<vmem>>) attributes {dimension_semantics = [#tpu.dimension_semantics<parallel>], iteration_bounds = array<i64: 1>, scalar_prefetch = 0 : i64, scratch_operands = 0 : i64, tpu.core_type = #tpu.core_type<tc>, window_params = [{transform_indices = @transform_0, window_bounds = array<i64: 128, 32>}, {transform_indices = @transform_1, window_bounds = array<i64: 128, 32>}, {transform_indices = @transform_2, window_bounds = array<i64: 1, 128>}]} {
    %c0 = arith.constant 0 : index
    %c0_0 = arith.constant 0 : index
    %0 = vector.load %arg2[%c0, %c0_0] : memref<128x32xf32, #tpu.memory_space<vmem>>, vector<128x32xf32>
    %cst = arith.constant 5.000000e-01 : f32
    %1 = vector.broadcast %cst : f32 to vector<128x32xf32>
    %2 = arith.mulf %0, %1 : vector<128x32xf32>
    %cst_1 = arith.constant dense<0xFF800000> : vector<128xf32>
    %3 = vector.multi_reduction <maximumf>, %2, %cst_1 [1] : vector<128x32xf32> to vector<128xf32>
    %4 = vector.shape_cast %3 : vector<128xf32> to vector<128x1xf32>
    %5 = vector.broadcast %4 : vector<128x1xf32> to vector<128x32xf32>
    %6 = arith.subf %2, %5 : vector<128x32xf32>
    %7 = math.exp %6 : vector<128x32xf32>
    %cst_2 = arith.constant dense<0.000000e+00> : vector<128xf32>
    %8 = vector.multi_reduction <add>, %7, %cst_2 [1] : vector<128x32xf32> to vector<128xf32>
    %9 = vector.shape_cast %8 : vector<128xf32> to vector<128x1xf32>
    %c0_3 = arith.constant 0 : index
    %c0_4 = arith.constant 0 : index
    %10 = vector.load %arg1[%c0_3, %c0_4] : memref<128x32xf32, #tpu.memory_space<vmem>>, vector<128x32xf32>
    %cst_5 = arith.constant 5.000000e-01 : f32
    %11 = vector.broadcast %cst_5 : f32 to vector<128x32xf32>
    %12 = arith.mulf %10, %11 : vector<128x32xf32>
    %cst_6 = arith.constant dense<0xFF800000> : vector<128xf32>
    %13 = vector.multi_reduction <maximumf>, %12, %cst_6 [1] : vector<128x32xf32> to vector<128xf32>
    %14 = vector.shape_cast %13 : vector<128xf32> to vector<128x1xf32>
    %15 = vector.broadcast %14 : vector<128x1xf32> to vector<128x32xf32>
    %16 = arith.subf %12, %15 : vector<128x32xf32>
    %17 = math.exp %16 : vector<128x32xf32>
    %cst_7 = arith.constant dense<0.000000e+00> : vector<128xf32>
    %18 = vector.multi_reduction <add>, %17, %cst_7 [1] : vector<128x32xf32> to vector<128xf32>
    %19 = vector.shape_cast %18 : vector<128xf32> to vector<128x1xf32>
    %cst_8 = arith.constant 3.125000e-07 : f32
    %20 = vector.broadcast %cst_8 : f32 to vector<128x1xf32>
    %21 = arith.mulf %20, %19 : vector<128x1xf32>
    %22 = vector.broadcast %21 : vector<128x1xf32> to vector<128x32xf32>
    %23 = arith.addf %17, %22 : vector<128x32xf32>
    %24 = math.log %23 : vector<128x32xf32>
    %25 = arith.mulf %7, %24 : vector<128x32xf32>
    %cst_9 = arith.constant dense<0.000000e+00> : vector<128xf32>
    %26 = vector.multi_reduction <add>, %25, %cst_9 [1] : vector<128x32xf32> to vector<128xf32>
    %27 = vector.shape_cast %26 : vector<128xf32> to vector<128x1xf32>
    %28 = math.log %19 : vector<128x1xf32>
    %cst_10 = arith.constant 9.99994972E-6 : f32
    %29 = vector.broadcast %cst_10 : f32 to vector<128x1xf32>
    %30 = arith.addf %28, %29 : vector<128x1xf32>
    %31 = arith.divf %27, %9 : vector<128x1xf32>
    %32 = arith.subf %30, %31 : vector<128x1xf32>
    %33 = vector.shape_cast %32 : vector<128x1xf32> to vector<1x128xf32>
    %c0_11 = arith.constant 0 : index
    %c0_12 = arith.constant 0 : index
    %34 = vector.load %arg3[%c0_11, %c0_12] : memref<1x128xf32, #tpu.memory_space<vmem>>, vector<1x128xf32>
    tpu.vector_store %arg3[%c0_11, %c0_12], %33 {strides = array<i32>} : memref<1x128xf32, #tpu.memory_space<vmem>>, vector<1x128xf32>,
    return
  }
  func.func @transform_0(%arg0: i32) -> (i32, i32) {
    %c0_i32 = arith.constant 0 : i32
    %c0_i32_0 = arith.constant 0 : i32
    return %arg0, %c0_i32 : i32, i32
  }
  func.func @transform_1(%arg0: i32) -> (i32, i32) {
    %c0_i32 = arith.constant 0 : i32
    %c0_i32_0 = arith.constant 0 : i32
    return %arg0, %c0_i32 : i32, i32
  }
  func.func @transform_2(%arg0: i32) -> (i32, i32) {
    %c0_i32 = arith.constant 0 : i32
    %c0_i32_0 = arith.constant 0 : i32
    return %c0_i32, %arg0 : i32, i32
  }
}

</mosaic_0001>

<bundles_post_ra>
// kernel: tpu_custom_call.1
= control target key start
LH: loop header
LB: loop body
LE: loop exit
PB: predicated region body
PF: predicated region fallthrough
CT: control target
= control target key end

     0   :  { %7 = vsyncpa [#allocation3], 0  ;;  %s2196_s0 = inlined_call_operand.hbm [shape: f32[16,32], index: 0, kind: input, shape index: {}]   ;;  %s2197_s1 = inlined_call_operand.hbm [shape: f32[16,32], index: 1, kind: input, shape index: {}]   ;;  %s2198_s2 = inlined_call_operand.hbm [shape: f32[1,128], index: 2, kind: output, shape index: {}]  }
   0x1   :  { %8 = vsyncpa [#allocation6], 0 }
   0x2   :  { %9 = vsyncpa [#allocation4], 0 }
   0x3   :  { %13 = vsyncadd [#allocation3], 1792  ;;  %s14_s11 = sshll.u32 %s2196_s0, 4  ;;  %s1171_s12 = smov [#allocation2]   ;;  %s15_s11 = int_to_ptr.hbm [resolvable:$true] %s14_s11 }
   0x4   :  { %s16_s13 = sshll.u32 %s1171_s12, 4  ;;  %s1172_s14 = smov 128   ;;  %s17_s13 = int_to_ptr.vmem [resolvable:$true] %s16_s13 }
   0x5   :  { %s1173_s15 = smov 8  }
   0x6   :  { %22 = dma.hbm_to_vmem [thread:$0]  %s15_s11, 256, %s17_s13, [#allocation3], %s1172_s14, %s1172_s14, %s1173_s15  }
   0x7   :  { %26 = vsyncadd [#allocation6], 1792  ;;  %s27_s18 = sshll.u32 %s2197_s1, 4  ;;  %s1174_s19 = smov [#allocation5]   ;;  %s28_s18 = int_to_ptr.hbm [resolvable:$true] %s27_s18 }
   0x8   :  { %s29_s20 = sshll.u32 %s1174_s19, 4  ;;  %s30_s20 = int_to_ptr.vmem [resolvable:$true] %s29_s20 }
   0x9   :  { %35 = dma.hbm_to_vmem [thread:$0]  %s28_s18, 256, %s30_s20, [#allocation6], %s1172_s14, %s1172_s14, %s1173_s15  }
   0xa   :  { %1165 = dma.done.wait [#allocation3], 2048  }
   0xb   :  { %1166 = vsyncadd [#allocation3], 4294965248 }
   0xc   :  { %1167 = dma.done.wait [#allocation6], 2048  }
   0xd   :  { %1168 = vsyncadd [#allocation6], 4294965248  ;;  %v48_v0 = vld [vmem:[#allocation5 + $0x20] sm:$0xff]  ;;  %vm76_vm0 = vcmask 261120   ;;  %v46_v1 = vld [vmem:[#allocation5 + $0x10] sm:$0xff]  ;;  %s1175_s0 = smov [#allocation7]  }
   0xe   :  { %v44_v2 = vld [vmem:[#allocation5] sm:$0xff]  ;;  %v1197_v3 = vmul.f32 0.5, %v48_v0  ;;  %v1199_v4 = vmul.f32 0.5, %v46_v1  ;;  %v49_v6 = vld [vmem:[#allocation5 + $0x28] sm:$0xff]  ;;  %v47_v7 = vld [vmem:[#allocation5 + $0x18] sm:$0xff]  ;;  %s915_s1 = sshll.u32 %s1175_s0, 4  ;;  %s916_s1 = int_to_ptr.vmem [resolvable:$true] %s915_s1 }
   0xf   :  { %v1201_v5 = vmul.f32 0.5, %v44_v2  ;;  %v45_v11 = vld [vmem:[#allocation5 + $0x8] sm:$0xff]  ;;  %v1209_v12 = vmul.f32 0.5, %v49_v6  ;;  %v1211_v13 = vmul.f32 0.5, %v47_v7  ;;  %v52_v18 = vld [vmem:[#allocation5 + $0x40] sm:$0xff]  ;;  %v51_v19 = vld [vmem:[#allocation5 + $0x38] sm:$0xff] }
  0x10   :  { %v89_v8 = vsel %vm76_vm0, %v1197_v3, -inf  ;;  %v83_v9 = vsel %vm76_vm0, %v1199_v4, -inf  ;;  %v1213_v14 = vmul.f32 0.5, %v45_v11  ;;  %v50_v20 = vld [vmem:[#allocation5 + $0x30] sm:$0xff]  ;;  %v1221_v21 = vmul.f32 0.5, %v52_v18  ;;  %v55_v27 = vld [vmem:[#allocation5 + $0x58] sm:$0xff] }
  0x11   :  { %v77_v10 = vsel %vm76_vm0, %v1201_v5, -inf  ;;  %90 = vmax.xlane.f32.xlu2 %v89_v8  ;;  %84 = vmax.xlane.f32.xlu1 %v83_v9  ;;  %v92_v15 = vsel %vm76_vm0, %v1209_v12, -inf  ;;  %v86_v16 = vsel %vm76_vm0, %v1211_v13, -inf  ;;  %v1223_v22 = vmul.f32 0.5, %v51_v19  ;;  %v54_v28 = vld [vmem:[#allocation5 + $0x50] sm:$0xff]  ;;  %v53_v29 = vld [vmem:[#allocation5 + $0x48] sm:$0xff] }
  0x12   :  { %78 = vmax.xlane.f32.xlu0 %v77_v10  ;;  %v80_v17 = vsel %vm76_vm0, %v1213_v14, -inf  ;;  %v1225_v23 = vmul.f32 0.5, %v50_v20  ;;  %v101_v24 = vsel %vm76_vm0, %v1221_v21, -inf  ;;  %v1233_v30 = vmul.f32 0.5, %v55_v27  ;;  %v58_v36 = vld [vmem:[#allocation5 + $0x70] sm:$0xff]  ;;  %v57_v37 = vld [vmem:[#allocation5 + $0x68] sm:$0xff] }
  0x13   :  { %v98_v25 = vsel %vm76_vm0, %v1223_v22, -inf  ;;  %v1235_v31 = vmul.f32 0.5, %v54_v28  ;;  %v1237_v32 = vmul.f32 0.5, %v53_v29  ;;  %v56_v38 = vld [vmem:[#allocation5 + $0x60] sm:$0xff]  ;;  %v1245_v39 = vmul.f32 0.5, %v58_v36  ;;  %v223_v45 = vld [vmem:[#allocation2 + $0x10] sm:$0xff] }
  0x14   :  { %v95_v26 = vsel %vm76_vm0, %v1225_v23, -inf  ;;  %v110_v33 = vsel %vm76_vm0, %v1233_v30, -inf  ;;  %v1247_v40 = vmul.f32 0.5, %v57_v37  ;;  %v1249_v41 = vmul.f32 0.5, %v56_v38  ;;  %v222_v46 = vld [vmem:[#allocation2 + $0x8] sm:$0xff]  ;;  %v59_v47 = vld [vmem:[#allocation5 + $0x78] sm:$0xff] }
  0x15   :  { %v107_v34 = vsel %vm76_vm0, %v1235_v31, -inf  ;;  %v104_v35 = vsel %vm76_vm0, %v1237_v32, -inf  ;;  %v119_v42 = vsel %vm76_vm0, %v1245_v39, -inf  ;;  %v1257_v48 = vmul.f32 0.5, %v223_v45  ;;  %v226_v54 = vld [vmem:[#allocation2 + $0x28] sm:$0xff]  ;;  %v225_v55 = vld [vmem:[#allocation2 + $0x20] sm:$0xff] }
  0x16   :  { %v116_v43 = vsel %vm76_vm0, %v1247_v40, -inf  ;;  %v113_v44 = vsel %vm76_vm0, %v1249_v41, -inf  ;;  %v1259_v49 = vmul.f32 0.5, %v222_v46  ;;  %v1261_v50 = vmul.f32 0.5, %v59_v47  ;;  %v221_v56 = vld [vmem:[#allocation2] sm:$0xff]  ;;  %v228_v0 = vld [vmem:[#allocation2 + $0x38] sm:$0xff] }
  0x17   :  { %v259_v51 = vsel %vm76_vm0, %v1257_v48, -inf  ;;  %v1269_v57 = vmul.f32 0.5, %v226_v54  ;;  %v1271_v58 = vmul.f32 0.5, %v225_v55  ;;  %v1273_v59 = vmul.f32 0.5, %v221_v56  ;;  %v229_v63 = vld [vmem:[#allocation2 + $0x40] sm:$0xff]  ;;  %v224_v1 = vld [vmem:[#allocation2 + $0x18] sm:$0xff] }
  0x18   :  { %v256_v52 = vsel %vm76_vm0, %v1259_v49, -inf  ;;  %v122_v53 = vsel %vm76_vm0, %v1261_v50, -inf  ;;  %v1281_v2 = vmul.f32 0.5, %v229_v63  ;;  %v1283_v6 = vmul.f32 0.5, %v228_v0  ;;  %v232_v11 = vld [vmem:[#allocation2 + $0x58] sm:$0xff]  ;;  %v234_v27 = vld [vmem:[#allocation2 + $0x68] sm:$0xff] }
  0x19   :  { %93 = vmax.xlane.f32.xlu2 %v92_v15  ;;  %87 = vmax.xlane.f32.xlu1 %v86_v16  ;;  %v268_v60 = vsel %vm76_vm0, %v1269_v57, -inf  ;;  %v265_v61 = vsel %vm76_vm0, %v1271_v58, -inf  ;;  %v253_v62 = vsel %vm76_vm0, %v1273_v59, -inf  ;;  %v1285_v7 = vmul.f32 0.5, %v224_v1  ;;  %v231_v15 = vld [vmem:[#allocation2 + $0x50] sm:$0xff]  ;;  %v230_v28 = vld [vmem:[#allocation2 + $0x48] sm:$0xff] }
  0x1a   :  { %81 = vmax.xlane.f32.xlu0 %v80_v17  ;;  %v277_v8 = vsel %vm76_vm0, %v1281_v2, -inf  ;;  %v274_v9 = vsel %vm76_vm0, %v1283_v6, -inf  ;;  %v227_v16 = vld [vmem:[#allocation2 + $0x30] sm:$0xff]  ;;  %v1293_v17 = vmul.f32 0.5, %v232_v11  ;;  %v1295_v18 = vmul.f32 0.5, %v231_v15  ;;  %v233_v38 = vld [vmem:[#allocation2 + $0x60] sm:$0xff] }
  0x1b   :  { %v262_v10 = vsel %vm76_vm0, %v1285_v7, -inf  ;;  %v1297_v19 = vmul.f32 0.5, %v227_v16  ;;  %s917_s23 = sshll.u32 %s2198_s2, 4  ;;  %s918_s23 = int_to_ptr.hbm [resolvable:$true] %s917_s23 }
  0x1c   :  { %v286_v20 = vsel %vm76_vm0, %v1293_v17, -inf }
  0x21   :  { %102 = vmax.xlane.f32.xlu2 %v101_v24  ;;  %99 = vmax.xlane.f32.xlu1 %v98_v25  ;;  %v283_v24 = vsel %vm76_vm0, %v1295_v18, -inf  ;;  %v271_v25 = vsel %vm76_vm0, %v1297_v19, -inf }
  0x22   :  { %96 = vmax.xlane.f32.xlu0 %v95_v26  ;;  %v235_v26 = vld [vmem:[#allocation2 + $0x70] sm:$0xff] }
  0x23   :  { %v1305_v29 = vmul.f32 0.5, %v235_v26 }
  0x29   :  { %111 = vmax.xlane.f32.xlu2 %v110_v33  ;;  %108 = vmax.xlane.f32.xlu1 %v107_v34  ;;  %v1307_v33 = vmul.f32 0.5, %v234_v27  ;;  %v1309_v34 = vmul.f32 0.5, %v230_v28 }
  0x2a   :  { %105 = vmax.xlane.f32.xlu0 %v104_v35  ;;  %v295_v35 = vsel %vm76_vm0, %v1305_v29, -inf }
  0x2b   :  { %v292_v36 = vsel %vm76_vm0, %v1307_v33, -inf  ;;  %v280_v37 = vsel %vm76_vm0, %v1309_v34, -inf }
  0x31   :  { %120 = vmax.xlane.f32.xlu2 %v119_v42  ;;  %117 = vmax.xlane.f32.xlu1 %v116_v43  ;;  %v1317_v42 = vmul.f32 0.5, %v233_v38 }
  0x32   :  { %114 = vmax.xlane.f32.xlu0 %v113_v44  ;;  %v236_v44 = vld [vmem:[#allocation2 + $0x78] sm:$0xff] }
  0x33   :  { %v289_v43 = vsel %vm76_vm0, %v1317_v42, -inf  ;;  %v1321_v45 = vmul.f32 0.5, %v236_v44 }
  0x35   :  { %v298_v46 = vsel %vm76_vm0, %v1321_v45, -inf }
  0x39   :  { %260 = vmax.xlane.f32.xlu2 %v259_v51  ;;  %257 = vmax.xlane.f32.xlu1 %v256_v52 }
  0x3a   :  { %123 = vmax.xlane.f32.xlu0 %v122_v53 }
  0x41   :  { %269 = vmax.xlane.f32.xlu2 %v268_v60  ;;  %266 = vmax.xlane.f32.xlu1 %v265_v61 }
  0x42   :  { %254 = vmax.xlane.f32.xlu0 %v253_v62 }
  0x49   :  { %278 = vmax.xlane.f32.xlu2 %v277_v8  ;;  %275 = vmax.xlane.f32.xlu1 %v274_v9 }
  0x4a   :  { %263 = vmax.xlane.f32.xlu0 %v262_v10 }
  0x51   :  { %287 = vmax.xlane.f32.xlu2 %v286_v20  ;;  %284 = vmax.xlane.f32.xlu1 %v283_v24 }
  0x52   :  { %272 = vmax.xlane.f32.xlu0 %v271_v25 }
  0x59   :  { %296 = vmax.xlane.f32.xlu2 %v295_v35  ;;  %293 = vmax.xlane.f32.xlu1 %v292_v36 }
  0x5a   :  { %281 = vmax.xlane.f32.xlu0 %v280_v37 }
  0x62   :  { %290 = vmax.xlane.f32.xlu0 %v289_v43 }
  0x6a   :  { %299 = vmax.xlane.f32.xlu0 %v298_v46 }
  0x84   :  { %v91_v47 = vpop.xlane.xlu2 %90  ;;  %v85_v51 = vpop.xlane.xlu1 %84 }
  0x85   :  { %v127_v52 = vsub.f32 %v1199_v4, %v85_v51  ;;  %v79_v53 = vpop.xlane.xlu0 %78  ;;  %v129_v8 = vsub.f32 %v1197_v3, %v91_v47 }
  0x86   :  { %v125_v54 = vsub.f32 %v1201_v5, %v79_v53 }
  0x87   :  { %v145_v55 = vmul.f32 1.442695, %v127_v52 }
  0x88   :  { %v141_v56 = vmul.f32 1.442695, %v125_v54 }
  0x89   :  { %933 = vpow2.f32 %v145_v55 }
  0x8a   :  { %935 = vpow2.f32 %v141_v56 }
  0x8c   :  { %v94_v60 = vpop.xlane.xlu2 %93  ;;  %v88_v61 = vpop.xlane.xlu1 %87 }
  0x8d   :  { %v130_v62 = vsub.f32 %v1209_v12, %v94_v60  ;;  %v128_v63 = vsub.f32 %v1211_v13, %v88_v61  ;;  %v82_v0 = vpop.xlane.xlu0 %81  ;;  %v149_v13 = vmul.f32 1.442695, %v129_v8 }
  0x8e   :  { %v126_v1 = vsub.f32 %v1213_v14, %v82_v0 }
  0x8f   :  { %v151_v9 = vmul.f32 1.442695, %v130_v62  ;;  %v147_v4 = vmul.f32 1.442695, %v128_v63  ;;  %v1331_v10 = vpop.eup %933 }
  0x90   :  { %v143_v5 = vmul.f32 1.442695, %v126_v1  ;;  %v1333_v11 = vpop.eup %935  ;;  %v179_v15 = vsel %vm76_vm0, %v1331_v10, 0.0 }
  0x91   :  { %937 = vpow2.f32 %v151_v9  ;;  %v173_v12 = vsel %vm76_vm0, %v1333_v11, 0.0  ;;  %180 = vadd.xlane.f32.xlu0 %v179_v15 }
  0x92   :  { %939 = vpow2.f32 %v147_v4  ;;  %174 = vadd.xlane.f32.xlu1 %v173_v12 }
  0x93   :  { %941 = vpow2.f32 %v143_v5 }
  0x94   :  { %v103_v3 = vpop.xlane.xlu2 %102  ;;  %v100_v14 = vpop.xlane.xlu1 %99  ;;  %943 = vpow2.f32 %v149_v13 }
  0x95   :  { %v97_v16 = vpop.xlane.xlu0 %96  ;;  %v133_v20 = vsub.f32 %v1221_v21, %v103_v3  ;;  %v132_v26 = vsub.f32 %v1223_v22, %v100_v14 }
  0x96   :  { %v131_v24 = vsub.f32 %v1225_v23, %v97_v16 }
  0x97   :  { %v1341_v25 = vpop.eup %937  ;;  %v157_v38 = vmul.f32 1.442695, %v133_v20  ;;  %v155_v23 = vmul.f32 1.442695, %v132_v26 }
  0x98   :  { %v1344_v27 = vpop.eup %939  ;;  %v153_v28 = vmul.f32 1.442695, %v131_v24  ;;  %v188_v35 = vsel %vm76_vm0, %v1341_v25, 0.0 }
  0x99   :  { %v1348_v36 = vpop.eup %941  ;;  %v182_v37 = vsel %vm76_vm0, %v1344_v27, 0.0  ;;  %189 = vadd.xlane.f32.xlu0 %v188_v35 }
  0x9a   :  { %v176_v21 = vsel %vm76_vm0, %v1348_v36, 0.0  ;;  %945 = vpow2.f32 %v153_v28  ;;  %183 = vadd.xlane.f32.xlu1 %v182_v37  ;;  %v1358_v44 = vpop.eup %943 }
  0x9b   :  { %177 = vadd.xlane.f32.xlu2 %v176_v21  ;;  %947 = vpow2.f32 %v157_v38  ;;  %v185_v47 = vsel %vm76_vm0, %v1358_v44, 0.0 }
  0x9c   :  { %v1354_v22 = vpop.xlane.xlu2 %111  ;;  %v1356_v43 = vpop.xlane.xlu1 %108  ;;  %949 = vpow2.f32 %v155_v23 }
  0x9d   :  { %v1360_v46 = vpop.xlane.xlu0 %105 }
  0xa0   :  { %v1364_v51 = vpop.eup %945 }
  0xa1   :  { %v191_v52 = vsel %vm76_vm0, %v1364_v51, 0.0  ;;  %v1368_v53 = vpop.eup %947 }
  0xa2   :  { %192 = vadd.xlane.f32.xlu1 %v191_v52  ;;  %v1374_v56 = vpop.eup %949  ;;  %v197_v62 = vsel %vm76_vm0, %v1368_v53, 0.0 }
  0xa3   :  { %186 = vadd.xlane.f32.xlu2 %v185_v47  ;;  %v194_v61 = vsel %vm76_vm0, %v1374_v56, 0.0 }
  0xa4   :  { %v1370_v54 = vpop.xlane.xlu2 %120  ;;  %v1372_v55 = vpop.xlane.xlu1 %117 }
  0xa5   :  { %v1376_v60 = vpop.xlane.xlu0 %114 }
  0xaa   :  { %198 = vadd.xlane.f32.xlu1 %v197_v62 }
  0xab   :  { %195 = vadd.xlane.f32.xlu2 %v194_v61 }
  0xac   :  { %v261_v63 = vpop.xlane.xlu2 %260  ;;  %v258_v0 = vpop.xlane.xlu1 %257 }
  0xad   :  { %v303_v1 = vsub.f32 %v1257_v48, %v261_v63  ;;  %v302_v8 = vsub.f32 %v1259_v49, %v258_v0  ;;  %v1384_v9 = vpop.xlane.xlu0 %123 }
  0xaf   :  { %v321_v4 = vmul.f32 1.442695, %v303_v1  ;;  %v319_v5 = vmul.f32 1.442695, %v302_v8 }
  0xb1   :  { %951 = vpow2.f32 %v321_v4 }
  0xb2   :  { %953 = vpow2.f32 %v319_v5 }
  0xb4   :  { %v270_v15 = vpop.xlane.xlu2 %269  ;;  %v267_v12 = vpop.xlane.xlu1 %266 }
  0xb5   :  { %v306_v13 = vsub.f32 %v1269_v57, %v270_v15  ;;  %v305_v3 = vsub.f32 %v1271_v58, %v267_v12  ;;  %v255_v14 = vpop.xlane.xlu0 %254 }
  0xb6   :  { %v301_v16 = vsub.f32 %v1273_v59, %v255_v14 }
  0xb7   :  { %v1389_v20 = vpop.eup %951  ;;  %v327_v48 = vmul.f32 1.442695, %v306_v13  ;;  %v325_v24 = vmul.f32 1.442695, %v305_v3 }
  0xb8   :  { %v1391_v49 = vpop.eup %953  ;;  %v317_v26 = vmul.f32 1.442695, %v301_v16  ;;  %v355_v28 = vsel %vm76_vm0, %v1389_v20, 0.0 }
  0xb9   :  { %955 = vpow2.f32 %v327_v48  ;;  %v352_v35 = vsel %vm76_vm0, %v1391_v49, 0.0  ;;  %356 = vadd.xlane.f32.xlu1 %v355_v28 }
  0xba   :  { %957 = vpow2.f32 %v325_v24  ;;  %353 = vadd.xlane.f32.xlu0 %v352_v35 }
  0xbb   :  { %959 = vpow2.f32 %v317_v26 }
  0xbc   :  { %v279_v57 = vpop.xlane.xlu2 %278  ;;  %v276_v58 = vpop.xlane.xlu1 %275 }
  0xbd   :  { %v309_v59 = vsub.f32 %v1281_v2, %v279_v57  ;;  %v308_v37 = vsub.f32 %v1283_v6, %v276_v58  ;;  %v264_v38 = vpop.xlane.xlu0 %263 }
  0xbe   :  { %v304_v21 = vsub.f32 %v1285_v7, %v264_v38 }
  0xbf   :  { %v1400_v23 = vpop.eup %955  ;;  %v333_v47 = vmul.f32 1.442695, %v309_v59  ;;  %v331_v52 = vmul.f32 1.442695, %v308_v37  ;;  %v135_v37 = vsub.f32 %v1235_v31, %v1356_v43 }
  0xc0   :  { %v1402_v61 = vpop.eup %957  ;;  %v323_v62 = vmul.f32 1.442695, %v304_v21  ;;  %v364_v63 = vsel %vm76_vm0, %v1400_v23, 0.0 }
  0xc1   :  { %v1406_v0 = vpop.eup %959  ;;  %961 = vpow2.f32 %v333_v47  ;;  %v361_v2 = vsel %vm76_vm0, %v1402_v61, 0.0  ;;  %365 = vadd.xlane.f32.xlu1 %v364_v63  ;;  %v161_v43 = vmul.f32 1.442695, %v135_v37 }
  0xc2   :  { %963 = vpow2.f32 %v331_v52  ;;  %362 = vadd.xlane.f32.xlu0 %v361_v2  ;;  %v349_v6 = vsel %vm76_vm0, %v1406_v0, 0.0  ;;  %v134_v52 = vsub.f32 %v1237_v32, %v1360_v46 }
  0xc3   :  { %965 = vpow2.f32 %v323_v62  ;;  %350 = vadd.xlane.f32.xlu2 %v349_v6  ;;  %v138_v6 = vsub.f32 %v1247_v40, %v1372_v55 }
  0xc4   :  { %v288_v7 = vpop.xlane.xlu2 %287  ;;  %v285_v1 = vpop.xlane.xlu1 %284  ;;  %v159_v32 = vmul.f32 1.442695, %v134_v52 }
  0xc5   :  { %v312_v8 = vsub.f32 %v1293_v17, %v288_v7  ;;  %v311_v4 = vsub.f32 %v1295_v18, %v285_v1  ;;  %v273_v5 = vpop.xlane.xlu0 %272  ;;  %v137_v1 = vsub.f32 %v1249_v41, %v1376_v60  ;;  %v167_v55 = vmul.f32 1.442695, %v138_v6 }
  0xc6   :  { %v307_v15 = vsub.f32 %v1297_v19, %v273_v5 }
  0xc7   :  { %v1415_v12 = vpop.eup %961  ;;  %v339_v13 = vmul.f32 1.442695, %v312_v8  ;;  %v337_v3 = vmul.f32 1.442695, %v311_v4 }
  0xc8   :  { %v1417_v14 = vpop.eup %963  ;;  %v329_v16 = vmul.f32 1.442695, %v307_v15  ;;  %v373_v48 = vsel %vm76_vm0, %v1415_v12, 0.0  ;;  %v165_v15 = vmul.f32 1.442695, %v137_v1 }
  0xc9   :  { %v1421_v24 = vpop.eup %965  ;;  %967 = vpow2.f32 %v339_v13  ;;  %v370_v17 = vsel %vm76_vm0, %v1417_v14, 0.0  ;;  %374 = vadd.xlane.f32.xlu1 %v373_v48  ;;  %v140_v48 = vsub.f32 %v1261_v50, %v1384_v9 }
  0xca   :  { %969 = vpow2.f32 %v337_v3  ;;  %371 = vadd.xlane.f32.xlu0 %v370_v17  ;;  %v358_v18 = vsel %vm76_vm0, %v1421_v24, 0.0 }
  0xcb   :  { %971 = vpow2.f32 %v329_v16  ;;  %359 = vadd.xlane.f32.xlu2 %v358_v18 }
  0xcc   :  { %v297_v19 = vpop.xlane.xlu2 %296  ;;  %v294_v26 = vpop.xlane.xlu1 %293 }
  0xcd   :  { %v315_v28 = vsub.f32 %v1305_v29, %v297_v19  ;;  %v314_v35 = vsub.f32 %v1307_v33, %v294_v26  ;;  %v282_v57 = vpop.xlane.xlu0 %281  ;;  %v136_v19 = vsub.f32 %v1233_v30, %v1354_v22  ;;  %v139_v22 = vsub.f32 %v1245_v39, %v1370_v54 }
  0xce   :  { %v310_v58 = vsub.f32 %v1309_v34, %v282_v57 }
  0xcf   :  { %v1430_v59 = vpop.eup %967  ;;  %v345_v38 = vmul.f32 1.442695, %v315_v28  ;;  %v343_v21 = vmul.f32 1.442695, %v314_v35  ;;  %v171_v28 = vmul.f32 1.442695, %v140_v48 }
  0xd0   :  { %v1434_v47 = vpop.eup %969  ;;  %v335_v62 = vmul.f32 1.442695, %v310_v58  ;;  %v382_v29 = vsel %vm76_vm0, %v1430_v59, 0.0  ;;  %v163_v50 = vmul.f32 1.442695, %v136_v19 }
  0xd1   :  { %v1440_v33 = vpop.eup %971  ;;  %973 = vpow2.f32 %v345_v38  ;;  %v379_v34 = vsel %vm76_vm0, %v1434_v47, 0.0  ;;  %383 = vadd.xlane.f32.xlu1 %v382_v29  ;;  %v169_v38 = vmul.f32 1.442695, %v139_v22 }
  0xd2   :  { %975 = vpow2.f32 %v343_v21  ;;  %380 = vadd.xlane.f32.xlu0 %v379_v34  ;;  %v367_v31 = vsel %vm76_vm0, %v1440_v33, 0.0 }
  0xd3   :  { %977 = vpow2.f32 %v335_v62  ;;  %368 = vadd.xlane.f32.xlu2 %v367_v31 }
  0xd4   :  { %979 = vpow2.f32 %v161_v43 }
  0xd5   :  { %v291_v46 = vpop.xlane.xlu0 %290  ;;  %981 = vpow2.f32 %v159_v32 }
  0xd6   :  { %v313_v63 = vsub.f32 %v1317_v42, %v291_v46 }
  0xd7   :  { %v1447_v2 = vpop.eup %973 }
  0xd8   :  { %v1451_v7 = vpop.eup %975  ;;  %v341_v8 = vmul.f32 1.442695, %v313_v63  ;;  %v391_v4 = vsel %vm76_vm0, %v1447_v2, 0.0 }
  0xd9   :  { %v1457_v5 = vpop.eup %977  ;;  %v388_v42 = vsel %vm76_vm0, %v1451_v7, 0.0  ;;  %392 = vadd.xlane.f32.xlu1 %v391_v4 }
  0xda   :  { %983 = vpow2.f32 %v341_v8  ;;  %389 = vadd.xlane.f32.xlu0 %v388_v42  ;;  %v376_v40 = vsel %vm76_vm0, %v1457_v5, 0.0  ;;  %v1463_v13 = vpop.eup %979 }
  0xdb   :  { %377 = vadd.xlane.f32.xlu2 %v376_v40  ;;  %v1465_v60 = vpop.eup %981  ;;  %985 = vpow2.f32 %v167_v55  ;;  %v203_v18 = vsel %vm76_vm0, %v1463_v13, 0.0 }
  0xdc   :  { %987 = vpow2.f32 %v165_v15  ;;  %v200_v26 = vsel %vm76_vm0, %v1465_v60, 0.0 }
  0xdd   :  { %v300_v41 = vpop.xlane.xlu0 %299 }
  0xde   :  { %v316_v3 = vsub.f32 %v1321_v45, %v300_v41 }
  0xe0   :  { %v1468_v16 = vpop.eup %983  ;;  %v347_v17 = vmul.f32 1.442695, %v316_v3 }
  0xe1   :  { %204 = vadd.xlane.f32.xlu1 %v203_v18  ;;  %v385_v45 = vsel %vm76_vm0, %v1468_v16, 0.0  ;;  %v1480_v35 = vpop.eup %985 }
  0xe2   :  { %989 = vpow2.f32 %v347_v17  ;;  %201 = vadd.xlane.f32.xlu0 %v200_v26  ;;  %v1482_v9 = vpop.eup %987  ;;  %v212_v30 = vsel %vm76_vm0, %v1480_v35, 0.0 }
  0xe3   :  { %386 = vadd.xlane.f32.xlu2 %v385_v45  ;;  %991 = vpow2.f32 %v171_v28  ;;  %v209_v58 = vsel %vm76_vm0, %v1482_v9, 0.0 }
  0xe4   :  { %993 = vpow2.f32 %v163_v50 }
  0xe5   :  { %995 = vpow2.f32 %v169_v38 }
  0xe8   :  { %v1484_v57 = vpop.eup %989 }
  0xe9   :  { %213 = vadd.xlane.f32.xlu1 %v212_v30  ;;  %v394_v37 = vsel %vm76_vm0, %v1484_v57, 0.0  ;;  %v1494_v21 = vpop.eup %991 }
  0xea   :  { %210 = vadd.xlane.f32.xlu0 %v209_v58  ;;  %v1496_v52 = vpop.eup %993  ;;  %v218_v62 = vsel %vm76_vm0, %v1494_v21, 0.0 }
  0xeb   :  { %395 = vadd.xlane.f32.xlu2 %v394_v37  ;;  %v206_v39 = vsel %vm76_vm0, %v1496_v52, 0.0  ;;  %v1502_v54 = vpop.eup %995 }
  0xec   :  { %v215_v29 = vsel %vm76_vm0, %v1502_v54, 0.0 }
  0xf2   :  { %219 = vadd.xlane.f32.xlu0 %v218_v62 }
  0xf3   :  { %207 = vadd.xlane.f32.xlu2 %v206_v39 }
  0xfb   :  { %216 = vadd.xlane.f32.xlu2 %v215_v29 }
 0x104   :  { %v1514_v46 = vpop.xlane.xlu0 %180 }
 0x105   :  { %v1506_v34 = vpop.xlane.xlu1 %174  ;;  %vm608_vm1 = vweird.f32 %v1514_v46 }
 0x106   :  { %vm578_vm3 = vweird.f32 %v1506_v34 }
 0x10c   :  { %v1520_v1 = vpop.xlane.xlu0 %189 }
 0x10d   :  { %v1508_v31 = vpop.xlane.xlu1 %183  ;;  %vm653_vm8 = vweird.f32 %v1520_v1 }
 0x10e   :  { %v1510_v43 = vpop.xlane.xlu2 %177  ;;  %vm623_vm11 = vweird.f32 %v1508_v31 }
 0x10f   :  { %vm593_vm9 = vweird.f32 %v1510_v43 }
 0x115   :  { %v1512_v32 = vpop.xlane.xlu1 %192 }
 0x116   :  { %v1516_v63 = vpop.xlane.xlu2 %186 }
 0x11d   :  { %v1518_v6 = vpop.xlane.xlu1 %198 }
 0x11e   :  { %v1527_v40 = vpop.xlane.xlu2 %195 }
 0x12c   :  { %v1522_v8 = vpop.xlane.xlu1 %356 }
 0x12d   :  { %v399_v4 = vmul.f32 3.125e-07, %v1522_v8  ;;  %v1525_v42 = vpop.xlane.xlu0 %353 }
 0x12e   :  { %v398_v55 = vmul.f32 3.125e-07, %v1525_v42 }
 0x12f   :  { %v415_v15 = vadd.f32 %v1389_v20, %v399_v4 }
 0x130   :  { %v414_v41 = vadd.f32 %v1391_v49, %v398_v55 }
 0x131   :  { %997 = vlog2.f32 %v415_v15 }
 0x132   :  { %999 = vlog2.f32 %v414_v41 }
 0x134   :  { %v1532_v3 = vpop.xlane.xlu1 %365 }
 0x135   :  { %v402_v48 = vmul.f32 3.125e-07, %v1532_v3  ;;  %v1535_v17 = vpop.xlane.xlu0 %362 }
 0x136   :  { %v1537_v18 = vpop.xlane.xlu2 %350  ;;  %v401_v19 = vmul.f32 3.125e-07, %v1535_v17 }
 0x137   :  { %v998_v26 = vpop.eup %997  ;;  %v418_v45 = vadd.f32 %v1400_v23, %v402_v48  ;;  %v397_v28 = vmul.f32 3.125e-07, %v1537_v18 }
 0x138   :  { %v1000_v20 = vpop.eup %999  ;;  %v417_v49 = vadd.f32 %v1402_v61, %v401_v19  ;;  %v434_v50 = vmul.f32 0.6931472, %v998_v26 }
 0x139   :  { %1001 = vlog2.f32 %v418_v45  ;;  %v413_v30 = vadd.f32 %v1406_v0, %v397_v28  ;;  %v432_v22 = vmul.f32 0.6931472, %v1000_v20 }
 0x13a   :  { %1003 = vlog2.f32 %v417_v49  ;;  %v463_v58 = vmul.f32 %v1331_v10, %v434_v50 }
 0x13b   :  { %1005 = vlog2.f32 %v413_v30  ;;  %v462_v37 = vmul.f32 %v1348_v36, %v432_v22 }
 0x13c   :  { %v1546_v38 = vpop.xlane.xlu1 %374  ;;  %v483_v23 = vsel %vm76_vm0, %v463_v58, 0.0 }
 0x13d   :  { %v405_v62 = vmul.f32 3.125e-07, %v1546_v38  ;;  %v1550_v39 = vpop.xlane.xlu0 %371  ;;  %484 = vadd.xlane.f32.xlu0 %v483_v23  ;;  %v480_v61 = vsel %vm76_vm0, %v462_v37, 0.0 }
 0x13e   :  { %v1553_v29 = vpop.xlane.xlu2 %359  ;;  %v404_v0 = vmul.f32 3.125e-07, %v1550_v39  ;;  %481 = vadd.xlane.f32.xlu2 %v480_v61 }
 0x13f   :  { %v1002_v10 = vpop.eup %1001  ;;  %v421_v4 = vadd.f32 %v1415_v12, %v405_v62  ;;  %v400_v36 = vmul.f32 3.125e-07, %v1553_v29 }
 0x140   :  { %v1004_v55 = vpop.eup %1003  ;;  %v420_v15 = vadd.f32 %v1417_v14, %v404_v0  ;;  %v440_v41 = vmul.f32 0.6931472, %v1002_v10 }
 0x141   :  { %v1006_v48 = vpop.eup %1005  ;;  %1007 = vlog2.f32 %v421_v4  ;;  %v416_v19 = vadd.f32 %v1421_v24, %v400_v36  ;;  %v438_v26 = vmul.f32 0.6931472, %v1004_v55 }
 0x142   :  { %1009 = vlog2.f32 %v420_v15  ;;  %v466_v45 = vmul.f32 %v1341_v25, %v440_v41  ;;  %v430_v28 = vmul.f32 0.6931472, %v1006_v48 }
 0x143   :  { %1011 = vlog2.f32 %v416_v19  ;;  %v465_v20 = vmul.f32 %v1358_v44, %v438_v26 }
 0x144   :  { %v1562_v49 = vpop.xlane.xlu1 %383  ;;  %v492_v12 = vsel %vm76_vm0, %v466_v45, 0.0  ;;  %v461_v50 = vmul.f32 %v1333_v11, %v430_v28 }
 0x145   :  { %v408_v14 = vmul.f32 3.125e-07, %v1562_v49  ;;  %v1567_v30 = vpop.xlane.xlu0 %380  ;;  %493 = vadd.xlane.f32.xlu0 %v492_v12  ;;  %v489_v24 = vsel %vm76_vm0, %v465_v20, 0.0 }
 0x146   :  { %v1570_v22 = vpop.xlane.xlu2 %368  ;;  %v407_v25 = vmul.f32 3.125e-07, %v1567_v30  ;;  %490 = vadd.xlane.f32.xlu2 %v489_v24  ;;  %v477_v62 = vsel %vm76_vm0, %v461_v50, 0.0 }
 0x147   :  { %v1008_v58 = vpop.eup %1007  ;;  %v424_v44 = vadd.f32 %v1430_v59, %v408_v14  ;;  %v403_v37 = vmul.f32 3.125e-07, %v1570_v22  ;;  %478 = vadd.xlane.f32.xlu1 %v477_v62 }
 0x148   :  { %v1010_v23 = vpop.eup %1009  ;;  %v423_v11 = vadd.f32 %v1434_v47, %v407_v25  ;;  %v446_v61 = vmul.f32 0.6931472, %v1008_v58 }
 0x149   :  { %v1012_v0 = vpop.eup %1011  ;;  %1013 = vlog2.f32 %v424_v44  ;;  %v419_v10 = vadd.f32 %v1440_v33, %v403_v37  ;;  %v444_v4 = vmul.f32 0.6931472, %v1010_v23 }
 0x14a   :  { %1015 = vlog2.f32 %v423_v11  ;;  %v469_v36 = vmul.f32 %v1368_v53, %v446_v61  ;;  %v436_v55 = vmul.f32 0.6931472, %v1012_v0 }
 0x14b   :  { %1017 = vlog2.f32 %v419_v10  ;;  %v468_v59 = vmul.f32 %v1374_v56, %v444_v4 }
 0x14c   :  { %v1580_v15 = vpop.xlane.xlu1 %392  ;;  %v501_v47 = vsel %vm76_vm0, %v469_v36, 0.0  ;;  %v464_v41 = vmul.f32 %v1344_v27, %v436_v55 }
 0x14d   :  { %v411_v48 = vmul.f32 3.125e-07, %v1580_v15  ;;  %v1585_v19 = vpop.xlane.xlu0 %389  ;;  %502 = vadd.xlane.f32.xlu0 %v501_v47  ;;  %v498_v33 = vsel %vm76_vm0, %v468_v59, 0.0 }
 0x14e   :  { %v1588_v26 = vpop.xlane.xlu2 %377  ;;  %v410_v53 = vmul.f32 3.125e-07, %v1585_v19  ;;  %499 = vadd.xlane.f32.xlu2 %v498_v33  ;;  %v486_v12 = vsel %vm76_vm0, %v464_v41, 0.0 }
 0x14f   :  { %v1014_v45 = vpop.eup %1013  ;;  %v427_v56 = vadd.f32 %v1447_v2, %v411_v48  ;;  %v406_v28 = vmul.f32 3.125e-07, %v1588_v26  ;;  %487 = vadd.xlane.f32.xlu1 %v486_v12 }
 0x150   :  { %v1016_v20 = vpop.eup %1015  ;;  %v426_v27 = vadd.f32 %v1451_v7, %v410_v53  ;;  %v452_v50 = vmul.f32 0.6931472, %v1014_v45 }
 0x151   :  { %v1018_v14 = vpop.eup %1017  ;;  %1019 = vlog2.f32 %v427_v56  ;;  %v422_v24 = vadd.f32 %v1457_v5, %v406_v28  ;;  %v450_v25 = vmul.f32 0.6931472, %v1016_v20 }
 0x152   :  { %1021 = vlog2.f32 %v426_v27  ;;  %v472_v58 = vmul.f32 %v1496_v52, %v452_v50  ;;  %v442_v44 = vmul.f32 0.6931472, %v1018_v14 }
 0x153   :  { %1023 = vlog2.f32 %v422_v24  ;;  %v471_v2 = vmul.f32 %v1463_v13, %v450_v25 }
 0x154   :  { %v510_v37 = vsel %vm76_vm0, %v472_v58, 0.0  ;;  %v467_v7 = vmul.f32 %v1364_v51, %v442_v44 }
 0x155   :  { %511 = vadd.xlane.f32.xlu0 %v510_v37  ;;  %v507_v23 = vsel %vm76_vm0, %v471_v2, 0.0  ;;  %v612_v2 = vand.u32 2147483647, %v1514_v46 }
 0x156   :  { %v1601_v11 = vpop.xlane.xlu2 %386  ;;  %v495_v5 = vsel %vm76_vm0, %v467_v7, 0.0  ;;  %508 = vadd.xlane.f32.xlu2 %v507_v23  ;;  %v1648_v23 = vpop.xlane.xlu0 %201 }
 0x157   :  { %v1020_v62 = vpop.eup %1019  ;;  %v409_v61 = vmul.f32 3.125e-07, %v1601_v11  ;;  %496 = vadd.xlane.f32.xlu1 %v495_v5  ;;  %vm1674_vm6 = vcmp.eq.f32.partialorder %v612_v2, 8.507059e+37 }
 0x158   :  { %v1022_v52 = vpop.eup %1021  ;;  %v458_v0 = vmul.f32 0.6931472, %v1020_v62 }
 0x159   :  { %v1024_v10 = vpop.eup %1023  ;;  %v425_v13 = vadd.f32 %v1468_v16, %v409_v61  ;;  %v456_v4 = vmul.f32 0.6931472, %v1022_v52  ;;  %v614_v61 = vand.u32 2147483648, %v1514_v46  ;;  %v582_v52 = vand.u32 2147483647, %v1506_v34 }
 0x15a   :  { %v475_v51 = vmul.f32 %v1502_v54, %v458_v0  ;;  %v448_v36 = vmul.f32 0.6931472, %v1024_v10  ;;  %v584_v0 = vand.u32 2147483648, %v1506_v34  ;;  %v599_v10 = vand.u32 2147483648, %v1510_v43 }
 0x15b   :  { %1025 = vlog2.f32 %v425_v13  ;;  %v474_v55 = vmul.f32 %v1480_v35, %v456_v4  ;;  %v657_v13 = vand.u32 2147483647, %v1520_v1  ;;  %v659_v4 = vand.u32 2147483648, %v1520_v1 }
 0x15c   :  { %v519_v59 = vsel %vm76_vm0, %v475_v51, 0.0  ;;  %v470_v47 = vmul.f32 %v1465_v60, %v448_v36  ;;  %vm1678_vm7 = vcmp.eq.f32.partialorder %v582_v52, 8.507059e+37 }
 0x15d   :  { %520 = vadd.xlane.f32.xlu0 %v519_v59  ;;  %v516_v41 = vsel %vm76_vm0, %v474_v55, 0.0  ;;  %vm1711_vm12 = vcmp.eq.f32.partialorder %v657_v13, 8.507059e+37 }
 0x15e   :  { %v1611_v48 = vpop.xlane.xlu2 %395  ;;  %v504_v33 = vsel %vm76_vm0, %v470_v47, 0.0  ;;  %517 = vadd.xlane.f32.xlu2 %v516_v41 }
 0x15f   :  { %v412_v16 = vmul.f32 3.125e-07, %v1611_v48  ;;  %505 = vadd.xlane.f32.xlu1 %v504_v33 }
 0x161   :  { %v1026_v53 = vpop.eup %1025  ;;  %v428_v54 = vadd.f32 %v1484_v57, %v412_v16 }
 0x162   :  { %v454_v45 = vmul.f32 0.6931472, %v1026_v53  ;;  %v615_v53 = vor.u32 1.1754944e-38, %v614_v61 }
 0x163   :  { %1027 = vlog2.f32 %v428_v54  ;;  %v674_v54 = vand.u32 2147483648, %v1512_v32 }
 0x164   :  { %v473_v35 = vmul.f32 %v1482_v9, %v454_v45  ;;  %1029 = vrcp.f32 %v1514_v46 }
 0x165   :  { %1031 = vrcp.f32 %v1506_v34 }
 0x166   :  { %v513_v60 = vsel %vm76_vm0, %v473_v35, 0.0  ;;  %1033 = vrcp.f32 %v1520_v1  ;;  %v585_v35 = vor.u32 1.1754944e-38, %v584_v0  ;;  %v1733_v0 = vpop.xlane.xlu2 %207 }
 0x167   :  { %514 = vadd.xlane.f32.xlu1 %v513_v60  ;;  %1035 = vrcp.f32 %v1508_v31  ;;  %v629_v60 = vand.u32 2147483648, %v1508_v31 }
 0x168   :  { %1037 = vrcp.f32 %v1510_v43 }
 0x169   :  { %v1028_v56 = vpop.eup %1027  ;;  %1039 = vrcp.f32 %v1516_v63  ;;  %v630_v61 = vor.u32 1.1754944e-38, %v629_v60 }
 0x16a   :  { %v460_v28 = vmul.f32 0.6931472, %v1028_v56  ;;  %v1622_v57 = vpop.eup %1029  ;;  %1041 = vrcp.f32 %v1512_v32 }
 0x16b   :  { %v1624_v12 = vpop.eup %1031  ;;  %v604_v9 = vmul.f32 %v1622_v57, %v1514_v46  ;;  %1043 = vrcp.f32 %v1527_v40  ;;  %vm609_vm2 = vweird.f32 %v1622_v57  ;;  %v627_v46 = vand.u32 2147483647, %v1508_v31 }
 0x16c   :  { %v476_v20 = vmul.f32 %v1494_v21, %v460_v28  ;;  %v574_v21 = vmul.f32 %v1624_v12, %v1506_v34  ;;  %v1633_v14 = vpop.eup %1033  ;;  %1045 = vrcp.f32 %v1518_v6  ;;  %vm579_vm4 = vweird.f32 %v1624_v12  ;;  %vm1670_vm5 = vmor %vm608_vm1, %vm609_vm2 }
 0x16d   :  { %v605_v50 = vsub.f32 1.0, %v604_v9  ;;  %v1635_v25 = vpop.eup %1035  ;;  %v649_v7 = vmul.f32 %v1633_v14, %v1520_v1  ;;  %v597_v28 = vand.u32 2147483647, %v1510_v43  ;;  %vm1697_vm10 = vmor %vm578_vm3, %vm579_vm4  ;;  %v660_v9 = vor.u32 1.1754944e-38, %v659_v4 }
 0x16e   :  { %v522_v27 = vsel %vm76_vm0, %v476_v20, 0.0  ;;  %v575_v24 = vsub.f32 1.0, %v574_v21  ;;  %v1637_v58 = vpop.eup %1037  ;;  %v619_v37 = vmul.f32 %v1635_v25, %v1508_v31  ;;  %v1691_v20 = vor.u32 1.1754944e-38, %v599_v10 }
 0x16f   :  { %523 = vadd.xlane.f32.xlu1 %v522_v27  ;;  %v606_v44 = vmul.f32 %v1622_v57, %v605_v50  ;;  %v589_v62 = vmul.f32 %v1637_v58, %v1510_v43  ;;  %v650_v36 = vsub.f32 1.0, %v649_v7  ;;  %v1666_v47 = vpop.eup %1039  ;;  %vm654_vm13 = vweird.f32 %v1633_v14 }
 0x170   :  { %v576_v5 = vmul.f32 %v1624_v12, %v575_v24  ;;  %v620_v51 = vsub.f32 1.0, %v619_v37  ;;  %v1682_v45 = vpop.eup %1041  ;;  %v634_v37 = vmul.f32 %v1666_v47, %v1516_v63  ;;  %vm624_vm14 = vweird.f32 %v1635_v25  ;;  %vm1755_vm2 = vmor %vm653_vm8, %vm654_vm13 }
 0x171   :  { %v607_v55 = vadd.f32 %v1622_v57, %v606_v44  ;;  %v590_v41 = vsub.f32 1.0, %v589_v62  ;;  %v1687_v56 = vpop.eup %1043  ;;  %v651_v44 = vmul.f32 %v1633_v14, %v650_v36  ;;  %v664_v7 = vmul.f32 %v1682_v45, %v1512_v32  ;;  %vm1766_vm3 = vmor %vm623_vm11, %vm624_vm14 }
 0x172   :  { %v577_v59 = vadd.f32 %v1624_v12, %v576_v5  ;;  %v1702_v21 = vpop.eup %1045  ;;  %v621_v2 = vmul.f32 %v1635_v25, %v620_v51  ;;  %v1724_v5 = vpop.xlane.xlu0 %210  ;;  %vm1727_vm15 = vcmp.eq.f32.partialorder %v627_v46, 8.507059e+37  ;;  %vm594_vm0 = vweird.f32 %v1637_v58 }
 0x173   :  { %v611_v50 = vsel %vm1670_vm5, %v1622_v57, %v607_v55  ;;  %v591_v57 = vmul.f32 %v1637_v58, %v590_v41  ;;  %v694_v52 = vmul.f32 %v1702_v21, %v1518_v6  ;;  %vm1736_vm1 = vcmp.eq.f32.partialorder %v597_v28, 8.507059e+37 }
 0x174   :  { %v581_v24 = vsel %vm1697_vm10, %v1624_v12, %v577_v59  ;;  %v679_v12 = vmul.f32 %v1687_v56, %v1527_v40  ;;  %v1742_v13 = vsel %vm1674_vm6, %v615_v53, %v611_v50  ;;  %1047 = vlog2.f32 %v1522_v8  ;;  %vm1782_vm6 = vmor %vm593_vm9, %vm594_vm0 }
 0x175   :  { %v1746_v4 = vsel %vm1678_vm7, %v585_v35, %v581_v24  ;;  %v644_v51 = vand.u32 2147483648, %v1516_v63  ;;  %v652_v36 = vadd.f32 %v1633_v14, %v651_v44  ;;  %v622_v59 = vadd.f32 %v1635_v25, %v621_v2  ;;  %v1820_v44 = vpop.xlane.xlu1 %204 }
 0x176   :  { %v635_v41 = vsub.f32 1.0, %v634_v37  ;;  %v665_v33 = vsub.f32 1.0, %v664_v7  ;;  %1049 = vlog2.f32 %v1525_v42  ;;  %v592_v8 = vadd.f32 %v1637_v58, %v591_v57 }
 0x177   :  { %v680_v1 = vsub.f32 1.0, %v679_v12  ;;  %1051 = vlog2.f32 %v1532_v3  ;;  %vm638_vm4 = vweird.f32 %v1516_v63  ;;  %v642_v53 = vand.u32 2147483647, %v1516_v63 }
 0x178   :  { %v695_v42 = vsub.f32 1.0, %v694_v52  ;;  %1053 = vlog2.f32 %v1535_v17  ;;  %vm668_vm5 = vweird.f32 %v1512_v32  ;;  %v672_v31 = vand.u32 2147483647, %v1512_v32 }
 0x179   :  { %1055 = vlog2.f32 %v1537_v18  ;;  %v1786_v35 = vor.u32 1.1754944e-38, %v644_v51  ;;  %v656_v17 = vsel %vm1755_vm2, %v1633_v14, %v652_v36  ;;  %v626_v46 = vsel %vm1766_vm3, %v1635_v25, %v622_v59 }
 0x17a   :  { %1057 = vlog2.f32 %v1546_v38  ;;  %v596_v43 = vsel %vm1782_vm6, %v1637_v58, %v592_v8  ;;  %v636_v18 = vmul.f32 %v1666_v47, %v635_v41  ;;  %v666_v60 = vmul.f32 %v1682_v45, %v665_v33  ;;  %v1048_v28 = vpop.eup %1047 }
 0x17b   :  { %1059 = vlog2.f32 %v1550_v39  ;;  %vm639_vm7 = vweird.f32 %v1666_v47  ;;  %v681_v14 = vmul.f32 %v1687_v56, %v680_v1  ;;  %v1803_v27 = vor.u32 1.1754944e-38, %v674_v54 }
 0x17c   :  { %v1050_v25 = vpop.eup %1049  ;;  %1061 = vlog2.f32 %v1553_v29  ;;  %vm1806_vm8 = vcmp.eq.f32.partialorder %v642_v53, 8.507059e+37  ;;  %v1812_v58 = vsel %vm1711_vm12, %v660_v9, %v656_v17  ;;  %v1816_v39 = vsel %vm1727_vm15, %v630_v61, %v626_v46  ;;  %v1822_v29 = vpop.xlane.xlu0 %219  ;;  %vm1848_vm13 = vmor %vm638_vm4, %vm639_vm7 }
 0x17d   :  { %v696_v50 = vmul.f32 %v1702_v21, %v695_v42  ;;  %v1052_v24 = vpop.eup %1051  ;;  %1063 = vlog2.f32 %v1562_v49  ;;  %v601_v2 = vsel %vm1736_vm1, %v1691_v20, %v596_v43  ;;  %vm683_vm9 = vweird.f32 %v1527_v40  ;;  %v1834_v49 = vpop.xlane.xlu2 %216 }
 0x17e   :  { %v687_v9 = vand.u32 2147483647, %v1527_v40  ;;  %vm1829_vm10 = vcmp.eq.f32.partialorder %v672_v31, 8.507059e+37  ;;  %v1054_v37 = vpop.eup %1053  ;;  %1065 = vlog2.f32 %v1567_v30  ;;  %v637_v7 = vadd.f32 %v1666_v47, %v636_v18 }
 0x17f   :  { %v667_v57 = vadd.f32 %v1682_v45, %v666_v60  ;;  %vm669_vm11 = vweird.f32 %v1682_v45  ;;  %v1056_v20 = vpop.eup %1055  ;;  %1067 = vlog2.f32 %v1570_v22  ;;  %v682_v12 = vadd.f32 %v1687_v56, %v681_v14 }
 0x180   :  { %vm684_vm12 = vweird.f32 %v1687_v56  ;;  %v689_v62 = vand.u32 2147483648, %v1527_v40  ;;  %v1058_v61 = vpop.eup %1057  ;;  %1069 = vrcp.f32 %v1820_v44  ;;  %v697_v52 = vadd.f32 %v1702_v21, %v696_v50  ;;  %vm1866_vm1 = vmor %vm668_vm5, %vm669_vm11 }
 0x181   :  { %vm698_vm14 = vweird.f32 %v1518_v6  ;;  %vm699_vm15 = vweird.f32 %v1702_v21  ;;  %v1060_v22 = vpop.eup %1059  ;;  %1071 = vlog2.f32 %v1580_v15  ;;  %vm1856_vm0 = vcmp.eq.f32.partialorder %v687_v9, 8.507059e+37  ;;  %vm1878_vm2 = vmor %vm683_vm9, %vm684_vm12 }
 0x182   :  { %v702_v51 = vand.u32 2147483647, %v1518_v6  ;;  %v704_v63 = vand.u32 2147483648, %v1518_v6  ;;  %v1062_v55 = vpop.eup %1061  ;;  %v530_v59 = vmul.f32 0.6931472, %v1048_v28  ;;  %1073 = vlog2.f32 %v1585_v19  ;;  %vm1893_vm3 = vmor %vm698_vm14, %vm699_vm15 }
 0x183   :  { %v641_v15 = vsel %vm1848_vm13, %v1666_v47, %v637_v7  ;;  %v671_v32 = vsel %vm1866_vm1, %v1682_v45, %v667_v57  ;;  %v1064_v33 = vpop.eup %1063  ;;  %v528_v8 = vmul.f32 0.6931472, %v1050_v25  ;;  %v536_v16 = vmul.f32 0.6931472, %v1052_v24  ;;  %v1936_v7 = vpop.xlane.xlu1 %213 }
 0x184   :  { %1075 = vlog2.f32 %v1588_v26  ;;  %v686_v19 = vsel %vm1878_vm2, %v1687_v56, %v682_v12  ;;  %v1066_v47 = vpop.eup %1065  ;;  %v534_v1 = vmul.f32 0.6931472, %v1054_v37  ;;  %v690_v45 = vor.u32 1.1754944e-38, %v689_v62 }
 0x185   :  { %1077 = vrcp.f32 %v1648_v23  ;;  %v701_v26 = vsel %vm1893_vm3, %v1702_v21, %v697_v52  ;;  %v1068_v53 = vpop.eup %1067  ;;  %v526_v54 = vmul.f32 0.6931472, %v1056_v20  ;;  %v646_v6 = vsel %vm1806_vm8, %v1786_v35, %v641_v15 }
 0x186   :  { %vm703_vm4 = vcmp.eq.f32.partialorder %v702_v51, 8.507059e+37  ;;  %v705_v42 = vor.u32 1.1754944e-38, %v704_v63  ;;  %v1904_v31 = vpop.eup %1069  ;;  %v1906_v3 = vadd.f32 9.99995e-06, %v530_v59  ;;  %v1913_v21 = vsel %vm1856_vm0, %v690_v45, %v686_v19 }
 0x187   :  { %v1918_v43 = vsel %vm1829_vm10, %v1803_v27, %v671_v32  ;;  %v1072_v35 = vpop.eup %1071  ;;  %v1920_v18 = vadd.f32 9.99995e-06, %v528_v8  ;;  %v1922_v60 = vadd.f32 9.99995e-06, %v536_v16  ;;  %v1928_v25 = vadd.f32 9.99995e-06, %v534_v1 }
 0x188   :  { %v1926_v14 = vsel %vm703_vm4, %v705_v42, %v701_v26  ;;  %v542_v38 = vmul.f32 0.6931472, %v1058_v61  ;;  %v540_v50 = vmul.f32 0.6931472, %v1060_v22  ;;  %v1932_v27 = vadd.f32 9.99995e-06, %v526_v54 }
 0x189   :  { %v532_v34 = vmul.f32 0.6931472, %v1062_v55  ;;  %v724_v37 = vmul.f32 %v1904_v31, %v1820_v44  ;;  %v548_v20 = vmul.f32 0.6931472, %v1064_v33  ;;  %v546_v12 = vmul.f32 0.6931472, %v1066_v47 }
 0x18a   :  { %1079 = vlog2.f32 %v1601_v11  ;;  %v845_v62 = vlaneseq  ;;  %v538_v61 = vmul.f32 0.6931472, %v1068_v53  ;;  %v554_v30 = vmul.f32 0.6931472, %v1072_v35 }
 0x18b   :  { %1081 = vrcp.f32 %v1733_v0  ;;  %v1944_v22 = vadd.f32 9.99995e-06, %v542_v38  ;;  %v1946_v10 = vadd.f32 9.99995e-06, %v540_v50  ;;  %v1949_v63 = vadd.f32 9.99995e-06, %v532_v34 }
 0x18c   :  { %1083 = vrcp.f32 %v1936_v7  ;;  %v725_v36 = vsub.f32 1.0, %v724_v37  ;;  %v734_v59 = vand.u32 2147483648, %v1820_v44  ;;  %v1954_v15 = vadd.f32 9.99995e-06, %v548_v20 }
 0x18d   :  { %v1956_v41 = vadd.f32 9.99995e-06, %v546_v12  ;;  %v1958_v32 = vand.u32 127, %v845_v62  ;;  %v1963_v16 = vadd.f32 9.99995e-06, %v538_v61  ;;  %1085 = vrcp.f32 %v1724_v5 }
 0x18e   :  { %v1965_v19 = vadd.f32 9.99995e-06, %v554_v30  ;;  %vm728_vm5 = vweird.f32 %v1820_v44  ;;  %v726_v42 = vmul.f32 %v1904_v31, %v725_v36  ;;  %v719_v38 = vand.u32 2147483648, %v1648_v23 }
 0x18f   :  { %1087 = vrcp.f32 %v1834_v49  ;;  %vm729_vm6 = vweird.f32 %v1904_v31  ;;  %vm713_vm7 = vweird.f32 %v1648_v23  ;;  %vm850_vm10 = vcmask 130112  }
 0x190   :  { %1089 = vlog2.f32 %v1611_v48  ;;  %v727_v62 = vadd.f32 %v1904_v31, %v726_v42  ;;  %vm854_vm11 = vcmask 195712   ;;  %vm2038_vm13 = vmor %vm728_vm5, %vm729_vm6  ;;  %vm773_vm0 = vweird.f32 %v1936_v7 }
 0x191   :  { %1091 = vrcp.f32 %v1822_v29  ;;  %vm858_vm1 = vcmask 261312   ;;  %vm862_vm2 = vcmask 326912   ;;  %vm866_vm3 = vcmask 392512  }
 0x192   :  { %v749_v37 = vand.u32 2147483648, %v1733_v0  ;;  %vm743_vm5 = vweird.f32 %v1733_v0 }
 0x1b0   :  { %v485_v56 = vpop.xlane.xlu0 %484 }
 0x1b1   :  { %v482_v17 = vpop.xlane.xlu2 %481  ;;  %v1909_v46 = vmul.f32 %v1742_v13, %v485_v56  ;;  %v1074_v13 = vpop.eup %1073 }
 0x1b2   :  { %v1924_v28 = vmul.f32 %v601_v2, %v482_v17  ;;  %v1076_v9 = vpop.eup %1075  ;;  %v552_v52 = vmul.f32 0.6931472, %v1074_v13  ;;  %v735_v17 = vor.u32 1.1754944e-38, %v734_v59  ;;  %v717_v13 = vand.u32 2147483647, %v1648_v23 }
 0x1b3   :  { %v815_v24 = vsub.f32 %v1906_v3, %v1909_v46  ;;  %v1940_v57 = vpop.eup %1077  ;;  %v544_v51 = vmul.f32 0.6931472, %v1076_v9  ;;  %v852_v9 = vadd.s32 4294967280, %v1958_v32  ;;  %v777_v59 = vand.u32 2147483647, %v1936_v7 }
 0x1b4   :  { %v814_v2 = vsub.f32 %v1920_v18, %v1924_v28  ;;  %v709_v55 = vmul.f32 %v1940_v57, %v1648_v23  ;;  %v1967_v40 = vadd.f32 9.99995e-06, %v552_v52  ;;  %v1080_v1 = vpop.eup %1079  ;;  %v848_v18 = vadd.s32 4294967288, %v1958_v32 }
 0x1b5   :  { %v1971_v45 = vadd.f32 9.99995e-06, %v544_v51  ;;  %v1978_v53 = vpop.eup %1081  ;;  %v1989_v50 = vmul.f32 0.6931472, %v1080_v1  ;;  %vm714_vm9 = vweird.f32 %v1940_v57  ;;  %v853_v36 = vperm.slane %v815_v24, %v852_v9 }
 0x1b6   :  { %v710_v54 = vsub.f32 1.0, %v709_v55  ;;  %v1983_v35 = vpop.eup %1083  ;;  %v739_v34 = vmul.f32 %v1978_v53, %v1733_v0  ;;  %v849_v30 = vperm.slane %v814_v2, %v848_v18  ;;  %vm2023_vm12 = vcmp.eq.f32.partialorder %v717_v13, 8.507059e+37  ;;  %vm2063_vm15 = vmor %vm713_vm7, %vm714_vm9 }
 0x1b7   :  { %v769_v20 = vmul.f32 %v1983_v35, %v1936_v7  ;;  %v2008_v61 = vpop.eup %1085  ;;  %v856_v13 = vadd.s32 4294967272, %v1958_v32  ;;  %v731_v9 = vsel %vm2038_vm13, %v1904_v31, %v727_v62  ;;  %vm774_vm14 = vweird.f32 %v1983_v35 }
 0x1b8   :  { %v494_v11 = vpop.xlane.xlu0 %493  ;;  %v711_v48 = vmul.f32 %v1940_v57, %v710_v54  ;;  %v2028_v54 = vpop.eup %1087  ;;  %v754_v3 = vmul.f32 %v2008_v61, %v1724_v5  ;;  %vm744_vm4 = vweird.f32 %v1978_v53  ;;  %vm759_vm9 = vweird.f32 %v2008_v61 }
 0x1b9   :  { %v491_v33 = vpop.xlane.xlu2 %490  ;;  %v1961_v8 = vmul.f32 %v1812_v58, %v494_v11  ;;  %v732_v58 = vand.u32 2147483647, %v1820_v44  ;;  %v720_v11 = vor.u32 1.1754944e-38, %v719_v38  ;;  %v2043_v18 = vpop.eup %1089  ;;  %v860_v44 = vadd.s32 4294967264, %v1958_v32  ;;  %vm2096_vm6 = vmor %vm743_vm5, %vm744_vm4 }
 0x1ba   :  { %v1969_v47 = vmul.f32 %v646_v6, %v491_v33  ;;  %v479_v56 = vpop.xlane.xlu1 %478  ;;  %v740_v33 = vsub.f32 1.0, %v739_v34  ;;  %v712_v42 = vadd.f32 %v1940_v57, %v711_v48  ;;  %v762_v34 = vand.u32 2147483647, %v1724_v5 }
 0x1bb   :  { %v818_v26 = vsub.f32 %v1922_v60, %v1961_v8  ;;  %v587_v28 = vmul.f32 %v1746_v4, %v479_v56  ;;  %vm1999_vm8 = vcmp.eq.f32.partialorder %v732_v58, 8.507059e+37  ;;  %v755_v62 = vsub.f32 1.0, %v754_v3 }
 0x1bc   :  { %v817_v6 = vsub.f32 %v1928_v25, %v1969_v47  ;;  %v736_v48 = vsel %vm1999_vm8, %v735_v17, %v731_v9  ;;  %vm758_vm8 = vweird.f32 %v1724_v5  ;;  %vm874_vm13 = vcmask 523712  }
 0x1bd   :  { %v813_v4 = vsub.f32 %v1932_v27, %v587_v28  ;;  %v770_v28 = vsub.f32 1.0, %v769_v20  ;;  %v864_v20 = vadd.s32 4294967256, %v1958_v32  ;;  %v756_v47 = vmul.f32 %v2008_v61, %v755_v62 }
 0x1be   :  { %vm886_vm4 = vcmask 720512  }
 0x1bf   :  { %v847_v27 = vperm.slane %v813_v4, %v1958_v32  ;;  %v784_v4 = vmul.f32 %v2028_v54, %v1834_v49  ;;  %v771_v23 = vmul.f32 %v1983_v35, %v770_v28 }
 0x1c0   :  { %v503_v12 = vpop.xlane.xlu0 %502 }
 0x1c1   :  { %v500_v52 = vpop.xlane.xlu2 %499  ;;  %v2012_v51 = vmul.f32 %v1926_v14, %v503_v12  ;;  %v851_v1 = vsel %vm850_vm10, %v849_v30, %v847_v27  ;;  %v779_v14 = vand.u32 2147483648, %v1936_v7  ;;  %v747_v27 = vand.u32 2147483647, %v1733_v0 }
 0x1c2   :  { %v2018_v55 = vmul.f32 %v1913_v21, %v500_v52  ;;  %v488_v46 = vpop.xlane.xlu1 %487  ;;  %v855_v21 = vsel %vm854_vm11, %v853_v36, %v851_v1  ;;  %v861_v52 = vperm.slane %v817_v6, %v860_v44  ;;  %v785_v17 = vsub.f32 1.0, %v784_v4  ;;  %v2084_v1 = vpop.eup %1091 }
 0x1c3   :  { %v821_v2 = vsub.f32 %v1944_v22, %v2012_v51  ;;  %v632_v38 = vmul.f32 %v1816_v39, %v488_v46  ;;  %v741_v39 = vmul.f32 %v1978_v53, %v740_v33  ;;  %v868_v6 = vadd.s32 4294967248, %v1958_v32 }
 0x1c4   :  { %v820_v24 = vsub.f32 %v1946_v10, %v2018_v55  ;;  %vm2100_vm7 = vcmp.eq.f32.partialorder %v747_v27, 8.507059e+37  ;;  %vm2113_vm10 = vcmp.eq.f32.partialorder %v777_v59, 8.507059e+37  ;;  %v786_v9 = vmul.f32 %v2028_v54, %v785_v17 }
 0x1c5   :  { %v816_v12 = vsub.f32 %v1949_v63, %v632_v38  ;;  %v716_v63 = vsel %vm2063_vm15, %v1940_v57, %v712_v42  ;;  %v865_v57 = vperm.slane %v818_v26, %v864_v20  ;;  %v742_v33 = vadd.f32 %v1978_v53, %v741_v39 }
 0x1c6   :  { %v721_v25 = vsel %vm2023_vm12, %v720_v11, %v716_v63  ;;  %v772_v26 = vadd.f32 %v1983_v35, %v771_v23  ;;  %v750_v11 = vor.u32 1.1754944e-38, %v749_v37  ;;  %v799_v44 = vmul.f32 %v2084_v1, %v1822_v29  ;;  %vm2124_vm12 = vmor %vm773_vm0, %vm774_vm14 }
 0x1c7   :  { %v857_v30 = vperm.slane %v816_v12, %v856_v13  ;;  %v746_v13 = vsel %vm2096_vm6, %v1978_v53, %v742_v33  ;;  %vm870_vm11 = vcmask 458112   ;;  %v757_v53 = vadd.f32 %v2008_v61, %v756_v47 }
 0x1c8   :  { %v512_v58 = vpop.xlane.xlu0 %511  ;;  %v764_v59 = vand.u32 2147483648, %v1724_v5  ;;  %v776_v20 = vsel %vm2124_vm12, %v1983_v35, %v772_v26  ;;  %vm789_vm15 = vweird.f32 %v2028_v54  ;;  %v751_v31 = vsel %vm2100_vm7, %v750_v11, %v746_v13 }
 0x1c9   :  { %v859_v36 = vsel %vm858_vm1, %v857_v30, %v855_v21  ;;  %v509_v8 = vpop.xlane.xlu2 %508  ;;  %v872_v21 = vadd.s32 4294967240, %v1958_v32  ;;  %vm878_vm14 = vcmask 589312   ;;  %v752_v30 = vmul.f32 %v751_v31, %v512_v58 }
 0x1ca   :  { %v863_v3 = vsel %vm862_vm2, %v861_v52, %v859_v36  ;;  %v497_v46 = vpop.xlane.xlu1 %496  ;;  %v737_v39 = vmul.f32 %v736_v48, %v509_v8  ;;  %v787_v27 = vadd.f32 %v2028_v54, %v786_v9  ;;  %v800_v35 = vsub.f32 1.0, %v799_v44  ;;  %vm2167_vm2 = vmor %vm758_vm8, %vm759_vm9 }
 0x1cb   :  { %v677_v56 = vmul.f32 %v1918_v43, %v497_v46  ;;  %v867_v60 = vsel %vm866_vm3, %v865_v57, %v863_v3  ;;  %v876_v43 = vadd.s32 4294967232, %v1958_v32  ;;  %v873_v12 = vperm.slane %v820_v24, %v872_v21 }
 0x1cc   :  { %vm788_vm0 = vweird.f32 %v1834_v49  ;;  %v794_v10 = vand.u32 2147483648, %v1834_v49  ;;  %v880_v55 = vadd.s32 4294967224, %v1958_v32  ;;  %v792_v37 = vand.u32 2147483647, %v1834_v49 }
 0x1cd   :  { %v819_v28 = vsub.f32 %v1963_v16, %v677_v56  ;;  %v877_v62 = vperm.slane %v821_v2, %v876_v43  ;;  %v884_v22 = vadd.s32 4294967216, %v1958_v32  ;;  %v823_v51 = vsub.f32 %v1956_v41, %v737_v39  ;;  %vm2153_vm1 = vmor %vm788_vm0, %vm789_vm15 }
 0x1ce   :  { %v780_v2 = vor.u32 1.1754944e-38, %v779_v14  ;;  %v765_v57 = vor.u32 1.1754944e-38, %v764_v59  ;;  %v888_v36 = vadd.s32 4294967208, %v1958_v32  ;;  %v824_v33 = vsub.f32 %v1954_v15, %v752_v30 }
 0x1cf   :  { %v869_v4 = vperm.slane %v819_v28, %v868_v6  ;;  %v791_v41 = vsel %vm2153_vm1, %v2028_v54, %v787_v27  ;;  %vm882_vm3 = vcmask 654912   ;;  %v795_v15 = vor.u32 1.1754944e-38, %v794_v10 }
 0x1d0   :  { %v781_v14 = vsel %vm2113_vm10, %v780_v2, %v776_v20  ;;  %v521_v46 = vpop.xlane.xlu0 %520  ;;  %vm793_vm5 = vcmp.eq.f32.partialorder %v792_v37, 8.507059e+37  ;;  %v885_v47 = vperm.slane %v823_v51, %v884_v22  ;;  %vm890_vm6 = vcmask 786112  }
 0x1d1   :  { %v871_v63 = vsel %vm870_vm11, %v869_v4, %v867_v60  ;;  %v518_v3 = vpop.xlane.xlu2 %517  ;;  %v796_v56 = vsel %vm793_vm5, %v795_v15, %v791_v41  ;;  %v889_v60 = vperm.slane %v824_v33, %v888_v36  ;;  %vm763_vm7 = vcmp.eq.f32.partialorder %v762_v34, 8.507059e+37 }
 0x1d2   :  { %v875_v23 = vsel %vm874_vm13, %v873_v12, %v871_v63  ;;  %v506_v52 = vpop.xlane.xlu1 %505  ;;  %v782_v6 = vmul.f32 %v781_v14, %v518_v3  ;;  %v797_v26 = vmul.f32 %v796_v56, %v521_v46  ;;  %v569_v21 = vadd.f32 9.99995e-06, %v1989_v50 }
 0x1d3   :  { %v722_v24 = vmul.f32 %v721_v25, %v506_v52  ;;  %v879_v48 = vsel %vm878_vm14, %v877_v62, %v875_v23  ;;  %v801_v25 = vmul.f32 %v2084_v1, %v800_v35  ;;  %vm804_vm8 = vweird.f32 %v2084_v1 }
 0x1d4   :  { %v892_v11 = vadd.s32 4294967200, %v1958_v32  ;;  %v896_v13 = vadd.s32 4294967192, %v1958_v32  ;;  %v826_v38 = vsub.f32 %v1967_v40, %v782_v6  ;;  %vm803_vm9 = vweird.f32 %v1822_v29 }
 0x1d5   :  { %v822_v49 = vsub.f32 %v1971_v45, %v722_v24  ;;  %v761_v45 = vsel %vm2167_vm2, %v2008_v61, %v757_v53  ;;  %v802_v28 = vadd.f32 %v2084_v1, %v801_v25  ;;  %v809_v5 = vand.u32 2147483648, %v1822_v29  ;;  %vm805_vm11 = vmor %vm803_vm9, %vm804_vm8 }
 0x1d6   :  { %v766_v61 = vsel %vm763_vm7, %v765_v57, %v761_v45  ;;  %v900_v50 = vadd.s32 4294967184, %v1958_v32  ;;  %v827_v34 = vsub.f32 %v1965_v19, %v797_v26  ;;  %v807_v44 = vand.u32 2147483647, %v1822_v29 }
 0x1d7   :  { %v881_v54 = vperm.slane %v822_v49, %v880_v55  ;;  %vm894_vm10 = vcmask 851712   ;;  %v556_v16 = vmul.f32 0.6931472, %v2043_v18  ;;  %v806_v59 = vsel %vm805_vm11, %v2084_v1, %v802_v28 }
 0x1d8   :  { %vm898_vm12 = vcmask 917312   ;;  %v897_v40 = vperm.slane %v826_v38, %v896_v13  ;;  %v810_v4 = vor.u32 1.1754944e-38, %v809_v5  ;;  %vm902_vm13 = vcmask 982912  }
 0x1d9   :  { %v883_v8 = vsel %vm882_vm3, %v881_v54, %v879_v48  ;;  %v901_v20 = vperm.slane %v827_v34, %v900_v50  ;;  %vm808_vm15 = vcmp.eq.f32.partialorder %v807_v44, 8.507059e+37  ;;  %v572_v62 = vadd.f32 9.99995e-06, %v556_v16 }
 0x1da   :  { %v887_v42 = vsel %vm886_vm4, %v885_v47, %v883_v8  ;;  %v515_v0 = vpop.xlane.xlu1 %514  ;;  %v811_v31 = vsel %vm808_vm15, %v810_v4, %v806_v59  ;;  %v904_v29 = vadd.s32 4294967176, %v1958_v32  ;;  %vm906_vm14 = vcmask 1048512  }
 0x1db   :  { %v767_v58 = vmul.f32 %v766_v61, %v515_v0  ;;  %v891_v43 = vsel %vm890_vm6, %v889_v60, %v887_v42 }
 0x1dd   :  { %v825_v9 = vsub.f32 %v569_v21, %v767_v58 }
 0x1df   :  { %v893_v53 = vperm.slane %v825_v9, %v892_v11 }
 0x1e1   :  { %v895_v12 = vsel %vm894_vm10, %v893_v53, %v891_v43 }
 0x1e2   :  { %v524_v39 = vpop.xlane.xlu1 %523  ;;  %v899_v19 = vsel %vm898_vm12, %v897_v40, %v895_v12 }
 0x1e3   :  { %v812_v63 = vmul.f32 %v811_v31, %v524_v39  ;;  %v903_v30 = vsel %vm902_vm13, %v901_v20, %v899_v19 }
 0x1e5   :  { %v828_v27 = vsub.f32 %v572_v62, %v812_v63 }
 0x1e7   :  { %v905_v18 = vperm.slane %v828_v27, %v904_v29 }
 0x1e9   :  { %v907_v1 = vsel %vm906_vm14, %v905_v18, %v903_v30 }
 0x1ea   :  { %909 = vst [vmem:[#allocation7] sm:$0x1] %v907_v1 }
 0x1eb   :  { %920 = dma.vmem_to_hbm [thread:$0]  %s916_s1, 16, %s918_s23, [#allocation4]  }
 0x1ec   :  { %1169 = dma.done.wait [#allocation4], 16  }
 0x1ed   :  { %1170 = vsyncadd [#allocation4], 4294967280 }
 0x1ee   :  { %925 = vsyncpa [#allocation3], 1 }
 0x1ef   :  { %926 = vsyncpa [#allocation6], 1 }
 0x1f0   :  { %927 = vsyncpa [#allocation4], 1 }

</bundles_post_ra>
